<compile_context>
chip_gen: v6e
topology: v6e:2x2x1
jax: 0.10.0
libtpu: 0.0.40
codegen_flags: <defaults>
</compile_context>

<pallas_src>
import functools

import jax
import jax.numpy as jnp
from jax.experimental import pallas as pl
from jax.experimental.pallas import tpu as pltpu


def _user_graph_sample_kernel(w_ref, g_ref, feat_ref, out_ref, *, num_neighbors):
    # w_ref:    (Ut, K)  f32  per-user neighbor weights
    # g_ref:    (Ut, K)  i32  per-user neighbor row-indices into features1
    # feat_ref: (N,  D)  f32  full feature table (grid-invariant, VMEM-resident)
    # out_ref:  (Ut, D)
    w = w_ref[...]
    g = g_ref[...]
    feat = feat_ref[...]

    ut = w.shape[0]
    n = feat.shape[0]

    # Column ids along the lane axis: (Ut, N).
    col_ids = jax.lax.broadcasted_iota(jnp.int32, (ut, n), 1)

    # Dense scatter matrix: scat[u, n] = sum_k w[u, k] * (g[u, k] == n).
    # K is small & static -> unrolled VPU compare/select adds (static slices are free).
    scat = jnp.zeros((ut, n), jnp.float32)
    for k in range(num_neighbors):
        scat = scat + jnp.where(
            col_ids == g[:, k:k + 1],
            w[:, k:k + 1].astype(jnp.float32),
            0.0,
        )

    # One MXU matmul performs the gather + weighted sum in a single pass.
    out_ref[...] = jnp.dot(
        scat, feat, preferred_element_type=jnp.float32
    ).astype(out_ref.dtype)


def _pick_user_tile(num_user):
    # Prefer a sublane-aligned tile (multiple of 8) that still yields >=2 grid
    # steps so both TensorCores on v7x get work.
    for t in (256, 128, 64, 32, 16, 8):
        if num_user % t == 0 and num_user // t >= 2:
            return t
    return num_user


def user_graph_sample(features1, features2, user_graph, user_matrix):
    """features1: (N, D) float; features2: unused (API parity with the module);
    user_graph: (U, K) int indices into features1 rows; user_matrix: (U, K) float.
    Returns (U, D)."""
    del features2  # unused by the reference forward
    n_feat, dim = features1.shape
    num_user, num_neighbors = user_graph.shape

    ut = _pick_user_tile(num_user)
    grid = (num_user // ut,)

    kernel = functools.partial(
        _user_graph_sample_kernel, num_neighbors=num_neighbors
    )

    out = pl.pallas_call(
        kernel,
        out_shape=jax.ShapeDtypeStruct((num_user, dim), features1.dtype),
        grid_spec=pltpu.PrefetchScalarGridSpec(
            num_scalar_prefetch=0,
            grid=grid,
            in_specs=[
                pl.BlockSpec((ut, num_neighbors), lambda u: (u, 0)),  # weights tile
                pl.BlockSpec((ut, num_neighbors), lambda u: (u, 0)),  # index tile
                pl.BlockSpec((n_feat, dim), lambda u: (0, 0)),        # resident feature table
            ],
            out_specs=pl.BlockSpec((ut, dim), lambda u: (u, 0)),      # lane-dense output slab
        ),
        compiler_params=pltpu.CompilerParams(
            dimension_semantics=("parallel",),
        ),
    )(user_matrix, user_graph.astype(jnp.int32), features1)
    return out


def user_graph_sample_ref(features1, features2, user_graph, user_matrix):
    """Pure-JAX reference mirroring the PyTorch forward."""
    del features2
    u_features = features1[user_graph]                        # (U, K, D)
    return jnp.einsum("uk,ukd->ud", user_matrix, u_features)  # (U, D)


if __name__ == "__main__":
    # Small shapes implied by the forward: num_user=128, K=8 sampled neighbors,
    # dim_latent=32, feature table of 64 rows.
    U, K, N, D = 128, 8, 64, 32

    key = jax.random.PRNGKey(0)
    k_f1, k_f2, k_g, k_w = jax.random.split(key, 4)

    features1 = jax.random.normal(k_f1, (N, D), jnp.float32)
    features2 = jax.random.normal(k_f2, (N, D), jnp.float32)   # unused, API parity
    user_graph = jax.random.randint(k_g, (U, K), 0, N, jnp.int32)
    user_matrix = jax.random.uniform(k_w, (U, K), jnp.float32)

    out = user_graph_sample(features1, features2, user_graph, user_matrix)
    out = jax.block_until_ready(out)

    ref = user_graph_sample_ref(features1, features2, user_graph, user_matrix)
    assert out.shape == (U, D), out.shape
    assert jnp.allclose(out, ref, atol=1e-5, rtol=1e-5), float(jnp.max(jnp.abs(out - ref)))

    print("KERNEL_OK")
</pallas_src>

<mosaic_0001>
module attributes {stable_mosaic.version = 11 : i64} {
  func.func @_user_graph_sample_kernel(%arg0: i32, %arg1: memref<64x8xf32, #tpu.memory_space<vmem>>, %arg2: memref<64x8xi32, #tpu.memory_space<vmem>>, %arg3: memref<64x32xf32, #tpu.memory_space<vmem>>, %arg4: memref<64x32xf32, #tpu.memory_space<vmem>>) attributes {dimension_semantics = [#tpu.dimension_semantics<parallel>], iteration_bounds = array<i64: 2>, scalar_prefetch = 0 : i64, scratch_operands = 0 : i64, tpu.core_type = #tpu.core_type<tc>, window_params = [{transform_indices = @transform_0, window_bounds = array<i64: 64, 8>}, {transform_indices = @transform_1, window_bounds = array<i64: 64, 8>}, {pipeline_mode = #tpu.pipeline_mode<synchronous>, transform_indices = @transform_2, window_bounds = array<i64: 64, 32>}, {transform_indices = @transform_3, window_bounds = array<i64: 64, 32>}]} {
    %c0 = arith.constant 0 : index
    %c0_0 = arith.constant 0 : index
    %0 = vector.load %arg1[%c0, %c0_0] : memref<64x8xf32, #tpu.memory_space<vmem>>, vector<64x8xf32>
    %c0_1 = arith.constant 0 : index
    %c0_2 = arith.constant 0 : index
    %1 = vector.load %arg2[%c0_1, %c0_2] : memref<64x8xi32, #tpu.memory_space<vmem>>, vector<64x8xi32>
    %c0_3 = arith.constant 0 : index
    %c0_4 = arith.constant 0 : index
    %2 = vector.load %arg3[%c0_3, %c0_4] : memref<64x32xf32, #tpu.memory_space<vmem>>, vector<64x32xf32>
    %3 = tpu.iota {dimensions = array<i32: 1>} : vector<64x64xi32>
    %cst = arith.constant 0.000000e+00 : f32
    %4 = vector.broadcast %cst : f32 to vector<64x64xf32>
    %5 = vector.extract_strided_slice %1 {offsets = [0, 0], sizes = [64, 1], strides = [1, 1]} : vector<64x8xi32> to vector<64x1xi32>
    %6 = vector.broadcast %5 : vector<64x1xi32> to vector<64x64xi32>
    %7 = arith.cmpi eq, %3, %6 : vector<64x64xi32>
    %8 = vector.extract_strided_slice %0 {offsets = [0, 0], sizes = [64, 1], strides = [1, 1]} : vector<64x8xf32> to vector<64x1xf32>
    %cst_5 = arith.constant 0.000000e+00 : f32
    %9 = vector.shape_cast %8 : vector<64x1xf32> to vector<64x1xf32>
    %10 = vector.broadcast %9 : vector<64x1xf32> to vector<64x64xf32>
    %11 = vector.broadcast %cst_5 : f32 to vector<64x64xf32>
    %12 = arith.select %7, %10, %11 : vector<64x64xi1>, vector<64x64xf32>
    %13 = arith.addf %4, %12 : vector<64x64xf32>
    %14 = vector.extract_strided_slice %1 {offsets = [0, 1], sizes = [64, 1], strides = [1, 1]} : vector<64x8xi32> to vector<64x1xi32>
    %15 = vector.broadcast %14 : vector<64x1xi32> to vector<64x64xi32>
    %16 = arith.cmpi eq, %3, %15 : vector<64x64xi32>
    %17 = vector.extract_strided_slice %0 {offsets = [0, 1], sizes = [64, 1], strides = [1, 1]} : vector<64x8xf32> to vector<64x1xf32>
    %cst_6 = arith.constant 0.000000e+00 : f32
    %18 = vector.shape_cast %17 : vector<64x1xf32> to vector<64x1xf32>
    %19 = vector.broadcast %18 : vector<64x1xf32> to vector<64x64xf32>
    %20 = vector.broadcast %cst_6 : f32 to vector<64x64xf32>
    %21 = arith.select %16, %19, %20 : vector<64x64xi1>, vector<64x64xf32>
    %22 = arith.addf %13, %21 : vector<64x64xf32>
    %23 = vector.extract_strided_slice %1 {offsets = [0, 2], sizes = [64, 1], strides = [1, 1]} : vector<64x8xi32> to vector<64x1xi32>
    %24 = vector.broadcast %23 : vector<64x1xi32> to vector<64x64xi32>
    %25 = arith.cmpi eq, %3, %24 : vector<64x64xi32>
    %26 = vector.extract_strided_slice %0 {offsets = [0, 2], sizes = [64, 1], strides = [1, 1]} : vector<64x8xf32> to vector<64x1xf32>
    %cst_7 = arith.constant 0.000000e+00 : f32
    %27 = vector.shape_cast %26 : vector<64x1xf32> to vector<64x1xf32>
    %28 = vector.broadcast %27 : vector<64x1xf32> to vector<64x64xf32>
    %29 = vector.broadcast %cst_7 : f32 to vector<64x64xf32>
    %30 = arith.select %25, %28, %29 : vector<64x64xi1>, vector<64x64xf32>
    %31 = arith.addf %22, %30 : vector<64x64xf32>
    %32 = vector.extract_strided_slice %1 {offsets = [0, 3], sizes = [64, 1], strides = [1, 1]} : vector<64x8xi32> to vector<64x1xi32>
    %33 = vector.broadcast %32 : vector<64x1xi32> to vector<64x64xi32>
    %34 = arith.cmpi eq, %3, %33 : vector<64x64xi32>
    %35 = vector.extract_strided_slice %0 {offsets = [0, 3], sizes = [64, 1], strides = [1, 1]} : vector<64x8xf32> to vector<64x1xf32>
    %cst_8 = arith.constant 0.000000e+00 : f32
    %36 = vector.shape_cast %35 : vector<64x1xf32> to vector<64x1xf32>
    %37 = vector.broadcast %36 : vector<64x1xf32> to vector<64x64xf32>
    %38 = vector.broadcast %cst_8 : f32 to vector<64x64xf32>
    %39 = arith.select %34, %37, %38 : vector<64x64xi1>, vector<64x64xf32>
    %40 = arith.addf %31, %39 : vector<64x64xf32>
    %41 = vector.extract_strided_slice %1 {offsets = [0, 4], sizes = [64, 1], strides = [1, 1]} : vector<64x8xi32> to vector<64x1xi32>
    %42 = vector.broadcast %41 : vector<64x1xi32> to vector<64x64xi32>
    %43 = arith.cmpi eq, %3, %42 : vector<64x64xi32>
    %44 = vector.extract_strided_slice %0 {offsets = [0, 4], sizes = [64, 1], strides = [1, 1]} : vector<64x8xf32> to vector<64x1xf32>
    %cst_9 = arith.constant 0.000000e+00 : f32
    %45 = vector.shape_cast %44 : vector<64x1xf32> to vector<64x1xf32>
    %46 = vector.broadcast %45 : vector<64x1xf32> to vector<64x64xf32>
    %47 = vector.broadcast %cst_9 : f32 to vector<64x64xf32>
    %48 = arith.select %43, %46, %47 : vector<64x64xi1>, vector<64x64xf32>
    %49 = arith.addf %40, %48 : vector<64x64xf32>
    %50 = vector.extract_strided_slice %1 {offsets = [0, 5], sizes = [64, 1], strides = [1, 1]} : vector<64x8xi32> to vector<64x1xi32>
    %51 = vector.broadcast %50 : vector<64x1xi32> to vector<64x64xi32>
    %52 = arith.cmpi eq, %3, %51 : vector<64x64xi32>
    %53 = vector.extract_strided_slice %0 {offsets = [0, 5], sizes = [64, 1], strides = [1, 1]} : vector<64x8xf32> to vector<64x1xf32>
    %cst_10 = arith.constant 0.000000e+00 : f32
    %54 = vector.shape_cast %53 : vector<64x1xf32> to vector<64x1xf32>
    %55 = vector.broadcast %54 : vector<64x1xf32> to vector<64x64xf32>
    %56 = vector.broadcast %cst_10 : f32 to vector<64x64xf32>
    %57 = arith.select %52, %55, %56 : vector<64x64xi1>, vector<64x64xf32>
    %58 = arith.addf %49, %57 : vector<64x64xf32>
    %59 = vector.extract_strided_slice %1 {offsets = [0, 6], sizes = [64, 1], strides = [1, 1]} : vector<64x8xi32> to vector<64x1xi32>
    %60 = vector.broadcast %59 : vector<64x1xi32> to vector<64x64xi32>
    %61 = arith.cmpi eq, %3, %60 : vector<64x64xi32>
    %62 = vector.extract_strided_slice %0 {offsets = [0, 6], sizes = [64, 1], strides = [1, 1]} : vector<64x8xf32> to vector<64x1xf32>
    %cst_11 = arith.constant 0.000000e+00 : f32
    %63 = vector.shape_cast %62 : vector<64x1xf32> to vector<64x1xf32>
    %64 = vector.broadcast %63 : vector<64x1xf32> to vector<64x64xf32>
    %65 = vector.broadcast %cst_11 : f32 to vector<64x64xf32>
    %66 = arith.select %61, %64, %65 : vector<64x64xi1>, vector<64x64xf32>
    %67 = arith.addf %58, %66 : vector<64x64xf32>
    %68 = vector.extract_strided_slice %1 {offsets = [0, 7], sizes = [64, 1], strides = [1, 1]} : vector<64x8xi32> to vector<64x1xi32>
    %69 = vector.broadcast %68 : vector<64x1xi32> to vector<64x64xi32>
    %70 = arith.cmpi eq, %3, %69 : vector<64x64xi32>
    %71 = vector.extract_strided_slice %0 {offsets = [0, 7], sizes = [64, 1], strides = [1, 1]} : vector<64x8xf32> to vector<64x1xf32>
    %cst_12 = arith.constant 0.000000e+00 : f32
    %72 = vector.shape_cast %71 : vector<64x1xf32> to vector<64x1xf32>
    %73 = vector.broadcast %72 : vector<64x1xf32> to vector<64x64xf32>
    %74 = vector.broadcast %cst_12 : f32 to vector<64x64xf32>
    %75 = arith.select %70, %73, %74 : vector<64x64xi1>, vector<64x64xf32>
    %76 = arith.addf %67, %75 : vector<64x64xf32>
    %cst_13 = arith.constant dense<0.000000e+00> : vector<64x32xf32>
    %77 = tpu.matmul %76, %2, %cst_13 {dimension_numbers = #tpu.dot_dimension_numbers<[1], [0], [0], [1], [0, 0, 1, 1], [], []>} : vector<64x64xf32>, vector<64x32xf32>, vector<64x32xf32> -> vector<64x32xf32>
    %c0_14 = arith.constant 0 : index
    %c0_15 = arith.constant 0 : index
    %78 = vector.load %arg4[%c0_14, %c0_15] : memref<64x32xf32, #tpu.memory_space<vmem>>, vector<64x32xf32>
    tpu.vector_store %arg4[%c0_14, %c0_15], %77 {strides = array<i32>} : memref<64x32xf32, #tpu.memory_space<vmem>>, vector<64x32xf32>,
    return
  }
  func.func @transform_0(%arg0: i32) -> (i32, i32) {
    %c0_i32 = arith.constant 0 : i32
    %c0_i32_0 = arith.constant 0 : i32
    return %arg0, %c0_i32 : i32, i32
  }
  func.func @transform_1(%arg0: i32) -> (i32, i32) {
    %c0_i32 = arith.constant 0 : i32
    %c0_i32_0 = arith.constant 0 : i32
    return %arg0, %c0_i32 : i32, i32
  }
  func.func @transform_2(%arg0: i32) -> (i32, i32) {
    %c0_i32 = arith.constant 0 : i32
    %c0_i32_0 = arith.constant 0 : i32
    %c0_i32_1 = arith.constant 0 : i32
    return %c0_i32, %c0_i32_0 : i32, i32
  }
  func.func @transform_3(%arg0: i32) -> (i32, i32) {
    %c0_i32 = arith.constant 0 : i32
    %c0_i32_0 = arith.constant 0 : i32
    return %arg0, %c0_i32 : i32, i32
  }
}

</mosaic_0001>

<bundles_post_ra>
// kernel: tpu_custom_call.1
= control target key start
LH: loop header
LB: loop body
LE: loop exit
PB: predicated region body
PF: predicated region fallthrough
CT: control target
= control target key end

     0   :  { %s1242_s12 = smov 0   ;;  %s1710_s0 = inlined_call_operand.vmem [shape: f32[128,8], index: 0, kind: input, shape index: {}]   ;;  %s1711_s1 = inlined_call_operand.vmem [shape: s32[128,8], index: 1, kind: input, shape index: {}]   ;;  %s1712_s2 = inlined_call_operand.vmem [shape: f32[64,32], index: 2, kind: input, shape index: {}]   ;;  %s1713_s3 = inlined_call_operand.vmem [shape: f32[128,32], index: 3, kind: output, shape index: {}]  }
   0x1 LB: > { %s1077_s13 = sadd.s32 4294967295, %s1212_s12   ;;  %p1081_p0 = scmp.ge.s32.totalorder %s1212_s12, 1  ;;  %s1212_s12 = sphi %s1242_s12, %s13_s12  }
   0x2   : > { %p149_p1 = scmp.lt.s32.totalorder %s1212_s12, 3 }
   0x4   : > { %p150_p2 = pnand %p1081_p0, %p149_p1 }
   0x5   : > { %s1082_s14 = sshll.u32 (!%p150_p2), %s1077_s13, 3 }
   0x6   : > { %153 = sbr.rel (%p150_p2) target bundleno = 649 (0x289), region = 32  ;;  %p179_p3 = scmp.lt.s32.totalorder (!%p150_p2), %s1082_s14, 15 }
   0xb   : > { %v1214_v0 = vmov 0   ;;  %s1715_s14 = smov (!%p179_p3, %s1082_s14), 15  ;;  %v1215_v17 = vmov 1   ;;  %v1216_v18 = vmov 2   ;;  %v1217_v19 = vmov 3  }
   0xc   : > { %1175 = vset.pattern.permute.xlu1 %v1214_v0  ;;  %1174 = vset.pattern.permute.xlu0 %v1214_v0  ;;  %s1250_s15 = sshll.u32 %s1715_s14, 3  ;;  %v1218_v24 = vmov 4   ;;  %v1219_v35 = vmov 5   ;;  %v220_v44 = vlaneseq  ;;  %v1220_v53 = vmov 6  }
   0xd   : > { %s188_s18 = scalar_lea.vmem %s1711_s1, %s1250_s15  ;;  %s182_s21 = scalar_lea.vmem %s1710_s0, %s1250_s15  ;;  %v1221_v0 = vmov 7  }
   0xe   : > { %v1256_v1 = vld [vmem:[%s188_s18 + $0x10] sm:$0xff]  ;;  %v1258_v2 = vld [vmem:[%s188_s18] sm:$0xff]  ;;  %v1262_v3 = vld [vmem:[%s188_s18 + $0x18] sm:$0xff]  ;;  %v1421_v47 = vand.u32 127, %v220_v44  ;;  %s194_s14 = scalar_lea.vmem %s1713_s3, %s1250_s15 }
   0xf   : > { %229 = vperm.xlu1 %1175, %v1256_v1   ;;  %223 = vperm.xlu0 %1174, %v1258_v2   ;;  %v1264_v4 = vld [vmem:[%s188_s18 + $0x8] sm:$0xff]  ;;  %v1270_v6 = vld [vmem:[%s188_s18 + $0x20] sm:$0xff]  ;;  %v1274_v7 = vld [vmem:[%s188_s18 + $0x38] sm:$0xff] }
  0x10   : > { %v1268_v5 = vld [vmem:[%s188_s18 + $0x28] sm:$0xff]  ;;  %v1276_v8 = vld [vmem:[%s188_s18 + $0x30] sm:$0xff]  ;;  %v1286_v10 = vld [vmem:[%s182_s21] sm:$0xff] }
  0x11   : > { %v1284_v9 = vld [vmem:[%s182_s21 + $0x8] sm:$0xff]  ;;  %v1290_v11 = vld [vmem:[%s182_s21 + $0x18] sm:$0xff]  ;;  %v1292_v12 = vld [vmem:[%s182_s21 + $0x10] sm:$0xff] }
  0x12   : > { %v1296_v13 = vld [vmem:[%s182_s21 + $0x28] sm:$0xff]  ;;  %v1298_v14 = vld [vmem:[%s182_s21 + $0x20] sm:$0xff]  ;;  %v1302_v15 = vld [vmem:[%s182_s21 + $0x38] sm:$0xff] }
  0x13   : > { %232 = vperm.xlu1 %1175, %v1262_v3   ;;  %226 = vperm.xlu0 %1174, %v1264_v4   ;;  %v1304_v16 = vld [vmem:[%s182_s21 + $0x30] sm:$0xff] }
  0x17   : > { %238 = vperm.xlu1 %1175, %v1268_v5   ;;  %235 = vperm.xlu0 %1174, %v1270_v6  }
  0x1b   : > { %244 = vperm.xlu1 %1175, %v1274_v7   ;;  %241 = vperm.xlu0 %1174, %v1276_v8  }
  0x1f   : > { %261 = vperm.xlu1 %1175, %v1284_v9   ;;  %256 = vperm.xlu0 %1174, %v1286_v10  }
  0x23   : > { %271 = vperm.xlu1 %1175, %v1290_v11   ;;  %266 = vperm.xlu0 %1174, %v1292_v12  }
  0x27   : > { %281 = vperm.xlu1 %1175, %v1296_v13   ;;  %276 = vperm.xlu0 %1174, %v1298_v14  }
  0x2b   : > { %291 = vperm.xlu1 %1175, %v1302_v15   ;;  %286 = vperm.xlu0 %1174, %v1304_v16  }
  0x2f   : > { %1177 = vset.pattern.permute.xlu1 %v1215_v17  ;;  %1176 = vset.pattern.permute.xlu0 %v1215_v17 }
  0x30   : > { %314 = vperm.xlu1 %1177, %v1264_v4   ;;  %311 = vperm.xlu0 %1176, %v1258_v2  }
  0x34   : > { %317 = vperm.xlu1 %1177, %v1256_v1   ;;  %320 = vperm.xlu0 %1176, %v1262_v3  }
  0x38   : > { %323 = vperm.xlu1 %1177, %v1270_v6   ;;  %326 = vperm.xlu0 %1176, %v1268_v5  }
  0x3c   : > { %329 = vperm.xlu1 %1177, %v1276_v8   ;;  %332 = vperm.xlu0 %1176, %v1274_v7  }
  0x40   : > { %343 = vperm.xlu1 %1177, %v1286_v10   ;;  %347 = vperm.xlu0 %1176, %v1284_v9  }
  0x44   : > { %351 = vperm.xlu1 %1177, %v1292_v12   ;;  %355 = vperm.xlu0 %1176, %v1290_v11  }
  0x48   : > { %359 = vperm.xlu1 %1177, %v1298_v14   ;;  %363 = vperm.xlu0 %1176, %v1296_v13  }
  0x4c   : > { %367 = vperm.xlu1 %1177, %v1304_v16   ;;  %371 = vperm.xlu0 %1176, %v1302_v15  }
  0x50   : > { %1178 = vset.pattern.permute.xlu1 %v1216_v18  ;;  %1179 = vset.pattern.permute.xlu0 %v1216_v18 }
  0x51   : > { %391 = vperm.xlu1 %1178, %v1258_v2   ;;  %394 = vperm.xlu0 %1179, %v1264_v4  }
  0x55   : > { %397 = vperm.xlu1 %1178, %v1256_v1   ;;  %403 = vperm.xlu0 %1179, %v1270_v6  }
  0x59   : > { %400 = vperm.xlu1 %1178, %v1262_v3   ;;  %409 = vperm.xlu0 %1179, %v1276_v8  }
  0x5d   : > { %406 = vperm.xlu1 %1178, %v1268_v5   ;;  %423 = vperm.xlu0 %1179, %v1286_v10  }
  0x61   : > { %412 = vperm.xlu1 %1178, %v1274_v7   ;;  %431 = vperm.xlu0 %1179, %v1292_v12  }
  0x65   : > { %427 = vperm.xlu1 %1178, %v1284_v9   ;;  %439 = vperm.xlu0 %1179, %v1298_v14  }
  0x69   : > { %435 = vperm.xlu1 %1178, %v1290_v11   ;;  %447 = vperm.xlu0 %1179, %v1304_v16  }
  0x6d   : > { %443 = vperm.xlu1 %1178, %v1296_v13   ;;  %1180 = vset.pattern.permute.xlu0 %v1217_v19 }
  0x6e   : > { %471 = vperm.xlu0 %1180, %v1258_v2  }
  0x71   : > { %451 = vperm.xlu1 %1178, %v1302_v15  }
  0x72   : > { %480 = vperm.xlu0 %1180, %v1262_v3  }
  0x75   : > { %1181 = vset.pattern.permute.xlu1 %v1217_v19 }
  0x76   : > { %474 = vperm.xlu1 %1181, %v1264_v4   ;;  %486 = vperm.xlu0 %1180, %v1268_v5  }
  0x7a   : > { %477 = vperm.xlu1 %1181, %v1256_v1   ;;  %492 = vperm.xlu0 %1180, %v1274_v7  }
  0x7e   : > { %483 = vperm.xlu1 %1181, %v1270_v6   ;;  %507 = vperm.xlu0 %1180, %v1284_v9  }
  0x82   : > { %489 = vperm.xlu1 %1181, %v1276_v8   ;;  %515 = vperm.xlu0 %1180, %v1290_v11  }
  0x86   : > { %503 = vperm.xlu1 %1181, %v1286_v10   ;;  %523 = vperm.xlu0 %1180, %v1296_v13  }
  0x8a   : > { %v1352_v20 = vpop.permute.xlu1 %229  ;;  %v1354_v21 = vpop.permute.xlu0 %223  ;;  %511 = vperm.xlu1 %1181, %v1292_v12   ;;  %531 = vperm.xlu0 %1180, %v1302_v15  }
  0x8b   : > { %vm246_vm3 = vcmp.eq.s32.totalorder %v1421_v47, %v1354_v21 }
  0x8e   : > { %v1358_v22 = vpop.permute.xlu1 %232  ;;  %v1360_v23 = vpop.permute.xlu0 %226  ;;  %519 = vperm.xlu1 %1181, %v1298_v14   ;;  %1186 = vset.pattern.permute.xlu0 %v1218_v24 }
  0x8f   : > { %563 = vperm.xlu0 %1186, %v1270_v6   ;;  %vm247_vm7 = vcmp.eq.s32.totalorder %v1421_v47, %v1360_v23 }
  0x92   : > { %v1365_v25 = vpop.permute.xlu1 %238  ;;  %v1367_v26 = vpop.permute.xlu0 %235  ;;  %1182 = vset.pattern.permute.xlu1 %v1218_v24 }
  0x93   : > { %551 = vperm.xlu1 %1182, %v1258_v2   ;;  %583 = vperm.xlu0 %1186, %v1286_v10   ;;  %vm250_vm6 = vcmp.eq.s32.totalorder %v1421_v47, %v1367_v26 }
  0x96   : > { %v1372_v27 = vpop.permute.xlu1 %244  ;;  %v1374_v28 = vpop.permute.xlu0 %241 }
  0x97   : > { %554 = vperm.xlu1 %1182, %v1264_v4   ;;  %587 = vperm.xlu0 %1186, %v1284_v9   ;;  %vm252_vm10 = vcmp.eq.s32.totalorder %v1421_v47, %v1374_v28  ;;  %vm253_vm15 = vcmp.eq.s32.totalorder %v1421_v47, %v1372_v27 }
  0x9a   : > { %v1378_v29 = vpop.permute.xlu1 %261  ;;  %v1380_v30 = vpop.permute.xlu0 %256 }
  0x9b   : > { %566 = vperm.xlu1 %1182, %v1268_v5   ;;  %591 = vperm.xlu0 %1186, %v1292_v12  }
  0x9e   : > { %v1384_v31 = vpop.permute.xlu1 %271  ;;  %v1386_v32 = vpop.permute.xlu0 %266 }
  0x9f   : > { %599 = vperm.xlu1 %1182, %v1298_v14   ;;  %595 = vperm.xlu0 %1186, %v1290_v11  }
  0xa2   : > { %v1390_v33 = vpop.permute.xlu1 %281  ;;  %v1392_v34 = vpop.permute.xlu0 %276 }
  0xa3   : > { %603 = vperm.xlu1 %1182, %v1296_v13   ;;  %1192 = vset.pattern.permute.xlu0 %v1219_v35  ;;  %v298_v26 = vsel %vm250_vm6, %v1392_v34, 0.0 }
  0xa4   : > { %631 = vperm.xlu0 %1192, %v1258_v2  }
  0xa6   : > { %v1397_v36 = vpop.permute.xlu1 %291  ;;  %v1399_v37 = vpop.permute.xlu0 %286 }
  0xa7   : > { %1183 = vset.pattern.permute.xlu1 %v1219_v35 }
  0xa8   : > { %643 = vperm.xlu1 %1183, %v1270_v6   ;;  %634 = vperm.xlu0 %1192, %v1264_v4  }
  0xab   : > { %v1404_v38 = vpop.permute.xlu1 %314  ;;  %v312_v39 = vpop.permute.xlu0 %311 }
  0xac   : > { %1184 = vset.pattern.permute.xlu1 %v1217_v19  ;;  %663 = vperm.xlu0 %1192, %v1286_v10   ;;  %vm334_vm4 = vcmp.eq.s32.totalorder %v1421_v47, %v312_v39  ;;  %v294_v19 = vsel %vm246_vm3, %v1380_v30, 0.0  ;;  %vm335_vm9 = vcmp.eq.s32.totalorder %v1421_v47, %v1404_v38 }
  0xad   : > { %527 = vperm.xlu1 %1184, %v1304_v16  }
  0xaf   : > { %v1408_v40 = vpop.permute.xlu1 %317  ;;  %v321_v41 = vpop.permute.xlu0 %320 }
  0xb0   : > { %667 = vperm.xlu0 %1192, %v1284_v9   ;;  %vm337_vm0 = vcmp.eq.s32.totalorder %v1421_v47, %v321_v41  ;;  %vm336_vm6 = vcmp.eq.s32.totalorder %v1421_v47, %v1408_v40 }
  0xb1   : > { %1185 = vset.pattern.permute.xlu1 %v1219_v35 }
  0xb2   : > { %646 = vperm.xlu1 %1185, %v1268_v5  }
  0xb3   : > { %v1413_v42 = vpop.permute.xlu1 %323  ;;  %v327_v43 = vpop.permute.xlu0 %326 }
  0xb4   : > { %649 = vperm.xlu0 %1192, %v1276_v8   ;;  %vm339_vm1 = vcmp.eq.s32.totalorder %v1421_v47, %v327_v43  ;;  %vm338_vm8 = vcmp.eq.s32.totalorder %v1421_v47, %v1413_v42 }
  0xb6   : > { %679 = vperm.xlu1 %1185, %v1298_v14  }
  0xb7   : > { %v1417_v45 = vpop.permute.xlu1 %329  ;;  %v333_v46 = vpop.permute.xlu0 %332 }
  0xb8   : > { %652 = vperm.xlu0 %1192, %v1274_v7   ;;  %vm341_vm2 = vcmp.eq.s32.totalorder %v1421_v47, %v333_v46  ;;  %vm340_vm13 = vcmp.eq.s32.totalorder %v1421_v47, %v1417_v45 }
  0xba   : > { %1187 = vset.pattern.permute.xlu1 %v1218_v24 }
  0xbb   : > { %557 = vperm.xlu1 %1187, %v1256_v1   ;;  %v344_v48 = vpop.permute.xlu1 %343  ;;  %v348_v49 = vpop.permute.xlu0 %347 }
  0xbc   : > { %691 = vperm.xlu0 %1192, %v1302_v15   ;;  %v374_v41 = vsel %vm334_vm4, %v344_v48, 0.0  ;;  %v375_v48 = vsel %vm335_vm9, %v348_v49, 0.0  ;;  %v300_v49 = vsel %vm252_vm10, %v1399_v37, 0.0  ;;  %vm248_vm10 = vcmp.eq.s32.totalorder %v1421_v47, %v1352_v20 }
  0xbd   : > { %v382_v43 = vadd.f32 %v374_v41, %v294_v19  ;;  %v296_v40 = vsel %vm248_vm10, %v1386_v32, 0.0 }
  0xbf   : > { %569 = vperm.xlu1 %1187, %v1276_v8   ;;  %v1427_v50 = vpop.permute.xlu1 %351  ;;  %v356_v51 = vpop.permute.xlu0 %355 }
  0xc0   : > { %v1429_v52 = vsel %vm337_vm0, %v356_v51, 0.0  ;;  %1200 = vset.pattern.permute.xlu0 %v1220_v53 }
  0xc1   : > { %723 = vperm.xlu0 %1200, %v1270_v6  }
  0xc3   : > { %1188 = vset.pattern.permute.xlu1 %v1219_v35  ;;  %v360_v54 = vpop.permute.xlu1 %359  ;;  %v364_v55 = vpop.permute.xlu0 %363 }
  0xc4   : > { %v1435_v56 = vsel %vm339_vm1, %v364_v55, 0.0  ;;  %683 = vperm.xlu1 %1188, %v1296_v13   ;;  %v378_v51 = vsel %vm338_vm8, %v360_v54, 0.0  ;;  %vm249_vm1 = vcmp.eq.s32.totalorder %v1421_v47, %v1358_v22 }
  0xc5   : > { %726 = vperm.xlu0 %1200, %v1268_v5   ;;  %v386_v34 = vadd.f32 %v378_v51, %v298_v26  ;;  %v297_v26 = vsel %vm249_vm1, %v1384_v31, 0.0 }
  0xc6   : > { %v385_v51 = vadd.f32 %v1429_v52, %v297_v26 }
  0xc7   : > { %v368_v57 = vpop.permute.xlu1 %367  ;;  %v372_v58 = vpop.permute.xlu0 %371 }
  0xc8   : > { %v1440_v59 = vsel %vm341_vm2, %v372_v58, 0.0  ;;  %1189 = vset.pattern.permute.xlu1 %v1220_v53  ;;  %v380_v28 = vsel %vm340_vm13, %v368_v57, 0.0 }
  0xc9   : > { %711 = vperm.xlu1 %1189, %v1258_v2   ;;  %732 = vperm.xlu0 %1200, %v1274_v7  }
  0xcc   : > { %v392_v60 = vpop.permute.xlu1 %391  ;;  %v395_v61 = vpop.permute.xlu0 %394 }
  0xcd   : > { %1190 = vset.pattern.permute.xlu1 %v1218_v24  ;;  %755 = vperm.xlu0 %1200, %v1290_v11   ;;  %vm414_vm5 = vcmp.eq.s32.totalorder %v1421_v47, %v392_v60  ;;  %vm415_vm11 = vcmp.eq.s32.totalorder %v1421_v47, %v395_v61 }
  0xce   : > { %560 = vperm.xlu1 %1190, %v1262_v3  }
  0xd0   : > { %v1448_v62 = vpop.permute.xlu1 %397  ;;  %v404_v63 = vpop.permute.xlu0 %403 }
  0xd1   : > { %1204 = vset.pattern.permute.xlu0 %v1221_v0  ;;  %vm418_vm12 = vcmp.eq.s32.totalorder %v1421_v47, %v404_v63 }
  0xd2   : > { %572 = vperm.xlu1 %1190, %v1274_v7   ;;  %791 = vperm.xlu0 %1204, %v1258_v2  }
  0xd4   : > { %v1456_v17 = vpop.permute.xlu1 %400  ;;  %v410_v18 = vpop.permute.xlu0 %409 }
  0xd5   : > { %vm420_vm14 = vcmp.eq.s32.totalorder %v1421_v47, %v410_v18  ;;  %vm417_vm2 = vcmp.eq.s32.totalorder %v1421_v47, %v1456_v17 }
  0xd6   : > { %607 = vperm.xlu1 %1190, %v1304_v16   ;;  %794 = vperm.xlu0 %1204, %v1264_v4  }
  0xd8   : > { %v1461_v44 = vpop.permute.xlu1 %406  ;;  %v424_v21 = vpop.permute.xlu0 %423 }
  0xd9   : > { %v454_v39 = vsel %vm414_vm5, %v424_v21, 0.0  ;;  %vm251_vm5 = vcmp.eq.s32.totalorder %v1421_v47, %v1365_v25 }
  0xda   : > { %v1466_v2 = vadd.f32 %v454_v39, %v382_v43  ;;  %1191 = vset.pattern.permute.xlu1 %v1220_v53  ;;  %839 = vperm.xlu0 %1204, %v1298_v14   ;;  %v299_v52 = vsel %vm251_vm5, %v1390_v33, 0.0  ;;  %v219_v33 = vld [vmem:[%s1712_s2 + $0x38] sm:$0xff] }
  0xdb   : > { %714 = vperm.xlu1 %1191, %v1264_v4   ;;  %v295_v4 = vsel %vm247_vm7, %v1378_v29, 0.0  ;;  %v388_v29 = vadd.f32 %v380_v28, %v300_v49  ;;  %vm419_vm7 = vcmp.eq.s32.totalorder %v1421_v47, %v1461_v44  ;;  %1114 = vmatprep.subr.mxu0 %v219_v33 }
  0xdc   : > { %v413_v30 = vpop.permute.xlu1 %412  ;;  %v1477_v46 = vpop.permute.xlu0 %431  ;;  %v383_v23 = vadd.f32 %v375_v48, %v295_v4  ;;  %1142 = vmatprep.subr.mxu1 %v219_v33  ;;  %1115 = vmatpush3.msra.mxu0 %v219_v33 }
  0xdd   : > { %vm421_vm0 = vcmp.eq.s32.totalorder %v1421_v47, %v413_v30  ;;  %1150 = vmatpush3.msra.mxu1 %v219_v33 }
  0xde   : > { %827 = vperm.xlu0 %1204, %v1284_v9  }
  0xdf   : > { %743 = vperm.xlu1 %1191, %v1286_v10  }
  0xe0   : > { %v428_v38 = vpop.permute.xlu1 %427  ;;  %v440_v42 = vpop.permute.xlu0 %439 }
  0xe1   : > { %v455_v54 = vsel %vm415_vm11, %v428_v38, 0.0  ;;  %v458_v55 = vsel %vm418_vm12, %v440_v42, 0.0  ;;  %vm416_vm11 = vcmp.eq.s32.totalorder %v1421_v47, %v1448_v62  ;;  %v218_v42 = vld [vmem:[%s1712_s2 + $0x30] sm:$0xff] }
  0xe2   : > { %v463_v58 = vadd.f32 %v455_v54, %v383_v23  ;;  %v1491_v60 = vadd.f32 %v458_v55, %v386_v34  ;;  %797 = vperm.xlu0 %1204, %v1256_v1   ;;  %v376_v23 = vsel %vm336_vm6, %v1427_v50, 0.0  ;;  %v456_v49 = vsel %vm416_vm11, %v1477_v46, 0.0  ;;  %1116 = vmatprep.subr.mxu0 %v218_v42  ;;  %v217_v46 = vld [vmem:[%s1712_s2 + $0x28] sm:$0xff] }
  0xe3   : > { %759 = vperm.xlu1 %1191, %v1298_v14   ;;  %v301_v14 = vsel %vm253_vm15, %v1397_v36, 0.0  ;;  %v384_v20 = vadd.f32 %v376_v23, %v296_v40  ;;  %1143 = vmatprep.subr.mxu1 %v218_v42 }
  0xe4   : > { %v436_v45 = vpop.permute.xlu1 %435  ;;  %v448_v61 = vpop.permute.xlu0 %447  ;;  %v389_v18 = vadd.f32 %v1440_v59, %v301_v14  ;;  %1117 = vmatpush3.msra.mxu0 %v218_v42  ;;  %1151 = vmatpush3.msra.mxu1 %v218_v42 }
  0xe5   : > { %v460_v63 = vsel %vm420_vm14, %v448_v61, 0.0  ;;  %v464_v55 = vadd.f32 %v456_v49, %v384_v20  ;;  %1118 = vmatprep.subr.mxu0 %v217_v46  ;;  %1144 = vmatprep.subr.mxu1 %v217_v46 }
  0xe6   : > { %v1495_v19 = vadd.f32 %v460_v63, %v388_v29  ;;  %812 = vperm.xlu0 %1204, %v1274_v7   ;;  %1119 = vmatpush3.msra.mxu0 %v217_v46 }
  0xe7   : > { %1193 = vset.pattern.permute.xlu1 %v1218_v24  ;;  %1152 = vmatpush3.msra.mxu1 %v217_v46 }
  0xe8   : > { %611 = vperm.xlu1 %1193, %v1302_v15   ;;  %v444_v37 = vpop.permute.xlu1 %443 }
  0xe9   : > { %v472_v57 = vpop.permute.xlu0 %471  ;;  %v459_v34 = vsel %vm419_vm7, %v444_v37, 0.0 }
  0xea   : > { %847 = vperm.xlu0 %1204, %v1304_v16   ;;  %vm494_vm8 = vcmp.eq.s32.totalorder %v1421_v47, %v472_v57  ;;  %v215_v57 = vld [vmem:[%s1712_s2 + $0x18] sm:$0xff] }
  0xec   : > { %1194 = vset.pattern.permute.xlu1 %v1219_v35  ;;  %v452_v7 = vpop.permute.xlu1 %451 }
  0xed   : > { %v461_v41 = vsel %vm421_vm0, %v452_v7, 0.0  ;;  %637 = vperm.xlu1 %1194, %v1256_v1   ;;  %v481_v24 = vpop.permute.xlu0 %480 }
  0xee   : > { %v1508_v43 = vadd.f32 %v461_v41, %v389_v18  ;;  %851 = vperm.xlu0 %1204, %v1302_v15   ;;  %vm497_vm4 = vcmp.eq.s32.totalorder %v1421_v47, %v481_v24  ;;  %v214_v18 = vld [vmem:[%s1712_s2 + $0x10] sm:$0xff] }
  0xf1   : > { %1195 = vset.pattern.permute.xlu1 %v1220_v53  ;;  %v475_v27 = vpop.permute.xlu1 %474  ;;  %v487_v21 = vpop.permute.xlu0 %486 }
  0xf2   : > { %747 = vperm.xlu1 %1195, %v1284_v9   ;;  %vm495_vm3 = vcmp.eq.s32.totalorder %v1421_v47, %v475_v27  ;;  %v457_v9 = vsel %vm417_vm2, %v436_v45, 0.0  ;;  %vm499_vm9 = vcmp.eq.s32.totalorder %v1421_v47, %v487_v21  ;;  %v212_v27 = vld [vmem:[%s1712_s2] sm:$0xff] }
  0xf3   : > { %v465_v22 = vadd.f32 %v457_v9, %v385_v51 }
  0xf5   : > { %v1513_v36 = vpop.permute.xlu1 %477  ;;  %v1515_v59 = vpop.permute.xlu0 %492 }
  0xf6   : > { %763 = vperm.xlu1 %1195, %v1296_v13   ;;  %vm501_vm12 = vcmp.eq.s32.totalorder %v1421_v47, %v1515_v59  ;;  %vm496_vm13 = vcmp.eq.s32.totalorder %v1421_v47, %v1513_v36 }
  0xf9   : > { %v1523_v39 = vpop.permute.xlu1 %483  ;;  %v508_v30 = vpop.permute.xlu0 %507 }
  0xfa   : > { %v535_v48 = vsel %vm495_vm3, %v508_v30, 0.0  ;;  %1196 = vset.pattern.permute.xlu1 %v1221_v0  ;;  %vm498_vm14 = vcmp.eq.s32.totalorder %v1421_v47, %v1523_v39 }
  0xfb   : > { %v1529_v4 = vadd.f32 %v535_v48, %v463_v58  ;;  %803 = vperm.xlu1 %1196, %v1270_v6   ;;  %v387_v6 = vadd.f32 %v1435_v56, %v299_v52 }
  0xfd   : > { %v1538_v31 = vpop.permute.xlu1 %489  ;;  %v516_v17 = vpop.permute.xlu0 %515  ;;  %v467_v50 = vadd.f32 %v459_v34, %v387_v6 }
  0xfe   : > { %v537_v38 = vsel %vm497_vm4, %v516_v17, 0.0  ;;  %vm500_vm4 = vcmp.eq.s32.totalorder %v1421_v47, %v1538_v31 }
  0xff   : > { %v1545_v25 = vadd.f32 %v537_v38, %v465_v22  ;;  %1197 = vset.pattern.permute.xlu1 %v1219_v35 }
 0x100   : > { %640 = vperm.xlu1 %1197, %v1262_v3  }
 0x101   : > { %v504_v56 = vpop.permute.xlu1 %503  ;;  %v524_v44 = vpop.permute.xlu0 %523 }
 0x102   : > { %v534_v28 = vsel %vm494_vm8, %v504_v56, 0.0  ;;  %v539_v32 = vsel %vm499_vm9, %v524_v44, 0.0 }
 0x103   : > { %v542_v62 = vadd.f32 %v534_v28, %v1466_v2  ;;  %v1568_v54 = vadd.f32 %v539_v32, %v467_v50  ;;  %v216_v2 = vld [vmem:[%s1712_s2 + $0x20] sm:$0xff] }
 0x104   : > { %671 = vperm.xlu1 %1197, %v1292_v12   ;;  %1120 = vmatprep.subr.mxu0 %v216_v2 }
 0x105   : > { %v512_v58 = vpop.permute.xlu1 %511  ;;  %v532_v29 = vpop.permute.xlu0 %531  ;;  %1121 = vmatpush3.msra.mxu0 %v216_v2  ;;  %1145 = vmatprep.subr.mxu1 %v216_v2 }
 0x106   : > { %v536_v45 = vsel %vm496_vm13, %v512_v58, 0.0  ;;  %v541_v61 = vsel %vm501_vm12, %v532_v29, 0.0  ;;  %1122 = vmatprep.subr.mxu0 %v215_v57  ;;  %1153 = vmatpush3.msra.mxu1 %v216_v2 }
 0x107   : > { %v1582_v63 = vadd.f32 %v536_v45, %v464_v55  ;;  %v1585_v37 = vadd.f32 %v541_v61, %v1508_v43  ;;  %1123 = vmatpush3.msra.mxu0 %v215_v57  ;;  %1146 = vmatprep.subr.mxu1 %v215_v57  ;;  %v213_v43 = vld [vmem:[%s1712_s2 + $0x8] sm:$0xff] }
 0x108   : > { %687 = vperm.xlu1 %1197, %v1304_v16   ;;  %1124 = vmatprep.subr.mxu0 %v214_v18 }
 0x109   : > { %v520_v14 = vpop.permute.xlu1 %519  ;;  %1125 = vmatpush3.msra.mxu0 %v214_v18  ;;  %1154 = vmatpush3.msra.mxu1 %v215_v57 }
 0x10a   : > { %v538_v7 = vsel %vm498_vm14, %v520_v14, 0.0  ;;  %v564_v41 = vpop.permute.xlu0 %563  ;;  %1126 = vmatprep.subr.mxu0 %v213_v43  ;;  %1147 = vmatprep.subr.mxu1 %v214_v18 }
 0x10b   : > { %v546_v24 = vadd.f32 %v538_v7, %v1491_v60  ;;  %1127 = vmatpush3.msra.mxu0 %v213_v43  ;;  %1155 = vmatpush3.msra.mxu1 %v214_v18  ;;  %vm578_vm1 = vcmp.eq.s32.totalorder %v1421_v47, %v564_v41 }
 0x10c   : > { %1198 = vset.pattern.permute.xlu1 %v1221_v0  ;;  %1128 = vmatprep.subr.mxu0 %v212_v27 }
 0x10d   : > { %806 = vperm.xlu1 %1198, %v1268_v5   ;;  %1129 = vmatpush3.msra.mxu0 %v212_v27 }
 0x10e   : > { %v552_v21 = vpop.permute.xlu1 %551  ;;  %v584_v36 = vpop.permute.xlu0 %583  ;;  %1148 = vmatprep.subr.mxu1 %v213_v43 }
 0x10f   : > { %vm574_vm15 = vcmp.eq.s32.totalorder %v1421_v47, %v552_v21  ;;  %1156 = vmatpush3.msra.mxu1 %v213_v43 }
 0x110   : > { %v614_v60 = vsel %vm574_vm15, %v584_v36, 0.0  ;;  %1149 = vmatprep.subr.mxu1 %v212_v27  ;;  %vm870_vm15 = vcmask 523264  }
 0x111   : > { %v622_v59 = vadd.f32 %v614_v60, %v542_v62  ;;  %823 = vperm.xlu1 %1198, %v1286_v10   ;;  %1157 = vmatpush3.msra.mxu1 %v212_v27 }
 0x112   : > { %v555_v5 = vpop.permute.xlu1 %554  ;;  %v588_v39 = vpop.permute.xlu0 %587 }
 0x113   : > { %vm575_vm0 = vcmp.eq.s32.totalorder %v1421_v47, %v555_v5 }
 0x114   : > { %v615_v30 = vsel %vm575_vm0, %v588_v39, 0.0 }
 0x115   : > { %v623_v26 = vadd.f32 %v615_v30, %v1529_v4  ;;  %1199 = vset.pattern.permute.xlu1 %v1219_v35 }
 0x116   : > { %675 = vperm.xlu1 %1199, %v1290_v11   ;;  %v567_v9 = vpop.permute.xlu1 %566  ;;  %v592_v48 = vpop.permute.xlu0 %591 }
 0x117   : > { %vm579_vm2 = vcmp.eq.s32.totalorder %v1421_v47, %v567_v9 }
 0x11a   : > { %1201 = vset.pattern.permute.xlu1 %v1220_v53  ;;  %v600_v10 = vpop.permute.xlu1 %599  ;;  %v596_v51 = vpop.permute.xlu0 %595 }
 0x11b   : > { %v618_v22 = vsel %vm578_vm1, %v600_v10, 0.0  ;;  %717 = vperm.xlu1 %1201, %v1256_v1  }
 0x11c   : > { %v626_v17 = vadd.f32 %v618_v22, %v546_v24 }
 0x11e   : > { %v604_v52 = vpop.permute.xlu1 %603 }
 0x11f   : > { %v619_v4 = vsel %vm579_vm2, %v604_v52, 0.0  ;;  %729 = vperm.xlu1 %1201, %v1276_v8   ;;  %v632_v35 = vpop.permute.xlu0 %631 }
 0x120   : > { %v627_v23 = vadd.f32 %v619_v4, %v1568_v54  ;;  %vm654_vm3 = vcmp.eq.s32.totalorder %v1421_v47, %v632_v35 }
 0x123   : > { %1202 = vset.pattern.permute.xlu1 %v1221_v0  ;;  %v644_v34 = vpop.permute.xlu1 %643  ;;  %v635_v38 = vpop.permute.xlu0 %634 }
 0x124   : > { %843 = vperm.xlu1 %1202, %v1296_v13   ;;  %vm655_vm5 = vcmp.eq.s32.totalorder %v1421_v47, %v635_v38  ;;  %vm658_vm6 = vcmp.eq.s32.totalorder %v1421_v47, %v644_v34 }
 0x127   : > { %v664_v6 = vpop.permute.xlu0 %663 }
 0x128   : > { %v694_v1 = vsel %vm654_vm3, %v664_v6, 0.0  ;;  %1203 = vset.pattern.permute.xlu1 %v1220_v53  ;;  %v528_v33 = vpop.permute.xlu1 %527 }
 0x129   : > { %v1624_v40 = vadd.f32 %v694_v1, %v622_v59  ;;  %v540_v50 = vsel %vm500_vm4, %v528_v33, 0.0  ;;  %720 = vperm.xlu1 %1203, %v1262_v3  }
 0x12a   : > { %v548_v56 = vadd.f32 %v540_v50, %v1495_v19 }
 0x12b   : > { %v668_v13 = vpop.permute.xlu0 %667 }
 0x12c   : > { %v695_v44 = vsel %vm655_vm5, %v668_v13, 0.0 }
 0x12d   : > { %v1628_v42 = vadd.f32 %v695_v44, %v623_v26  ;;  %751 = vperm.xlu1 %1203, %v1292_v12   ;;  %v647_v31 = vpop.permute.xlu1 %646 }
 0x12e   : > { %vm659_vm9 = vcmp.eq.s32.totalorder %v1421_v47, %v647_v31 }
 0x12f   : > { %v1631_v20 = vpop.permute.xlu0 %649 }
 0x130   : > { %vm660_vm1 = vcmp.eq.s32.totalorder %v1421_v47, %v1631_v20 }
 0x131   : > { %767 = vperm.xlu1 %1203, %v1304_v16   ;;  %v680_v53 = vpop.permute.xlu1 %679 }
 0x132   : > { %v698_v49 = vsel %vm658_vm6, %v680_v53, 0.0 }
 0x133   : > { %v706_v28 = vadd.f32 %v698_v49, %v626_v17  ;;  %v653_v32 = vpop.permute.xlu0 %652 }
 0x134   : > { %vm661_vm7 = vcmp.eq.s32.totalorder %v1421_v47, %v653_v32 }
 0x135   : > { %771 = vperm.xlu1 %1203, %v1302_v15  }
 0x136   : > { %v558_v19 = vpop.permute.xlu1 %557 }
 0x137   : > { %vm576_vm8 = vcmp.eq.s32.totalorder %v1421_v47, %v558_v19  ;;  %v692_v62 = vpop.permute.xlu0 %691 }
 0x138   : > { %v616_v54 = vsel %vm576_vm8, %v592_v48, 0.0  ;;  %v701_v46 = vsel %vm661_vm7, %v692_v62, 0.0 }
 0x139   : > { %v624_v55 = vadd.f32 %v616_v54, %v1582_v63  ;;  %1205 = vset.pattern.permute.xlu1 %v1221_v0 }
 0x13a   : > { %809 = vperm.xlu1 %1205, %v1276_v8   ;;  %v570_v16 = vpop.permute.xlu1 %569 }
 0x13b   : > { %vm580_vm11 = vcmp.eq.s32.totalorder %v1421_v47, %v570_v16 }
 0x13c   : > { %v724_v14 = vpop.permute.xlu0 %723 }
 0x13d   : > { %vm738_vm13 = vcmp.eq.s32.totalorder %v1421_v47, %v724_v14 }
 0x13e   : > { %800 = vperm.xlu1 %1205, %v1262_v3  }
 0x13f   : > { %v684_v15 = vpop.permute.xlu1 %683 }
 0x140   : > { %v699_v58 = vsel %vm659_vm9, %v684_v15, 0.0  ;;  %v727_v7 = vpop.permute.xlu0 %726 }
 0x141   : > { %v1643_v29 = vadd.f32 %v699_v58, %v627_v23  ;;  %vm739_vm7 = vcmp.eq.s32.totalorder %v1421_v47, %v727_v7 }
 0x142   : > { %831 = vperm.xlu1 %1205, %v1292_v12  }
 0x144   : > { %v712_v2 = vpop.permute.xlu1 %711  ;;  %v1650_v24 = vpop.permute.xlu0 %732 }
 0x145   : > { %vm734_vm3 = vcmp.eq.s32.totalorder %v1421_v47, %v712_v2  ;;  %vm741_vm9 = vcmp.eq.s32.totalorder %v1421_v47, %v1650_v24 }
 0x146   : > { %835 = vperm.xlu1 %1205, %v1290_v11  }
 0x148   : > { %v1653_v27 = vpop.permute.xlu0 %755 }
 0x149   : > { %v561_v45 = vpop.permute.xlu1 %560 }
 0x14a   : > { %vm577_vm10 = vcmp.eq.s32.totalorder %v1421_v47, %v561_v45 }
 0x14b   : > { %v617_v0 = vsel %vm577_vm10, %v596_v51, 0.0 }
 0x14c   : > { %v625_v8 = vadd.f32 %v617_v0, %v1545_v25 }
 0x14d   : > { %v573_v61 = vpop.permute.xlu1 %572  ;;  %v792_v60 = vpop.permute.xlu0 %791 }
 0x14e   : > { %vm581_vm12 = vcmp.eq.s32.totalorder %v1421_v47, %v573_v61  ;;  %vm814_vm5 = vcmp.eq.s32.totalorder %v1421_v47, %v792_v60 }
 0x151   : > { %v608_v3 = vpop.permute.xlu1 %607  ;;  %v795_v5 = vpop.permute.xlu0 %794 }
 0x152   : > { %v620_v63 = vsel %vm580_vm11, %v608_v3, 0.0  ;;  %vm815_vm4 = vcmp.eq.s32.totalorder %v1421_v47, %v795_v5 }
 0x153   : > { %v628_v57 = vadd.f32 %v620_v63, %v548_v56 }
 0x155   : > { %v840_v48 = vpop.permute.xlu0 %839 }
 0x156   : > { %v715_v18 = vpop.permute.xlu1 %714 }
 0x157   : > { %vm735_vm2 = vcmp.eq.s32.totalorder %v1421_v47, %v715_v18 }
 0x159   : > { %v828_v1 = vpop.permute.xlu0 %827 }
 0x15a   : > { %v744_v41 = vpop.permute.xlu1 %743  ;;  %v855_v56 = vsel %vm815_vm4, %v828_v1, 0.0 }
 0x15b   : > { %v774_v6 = vsel %vm734_vm3, %v744_v41, 0.0 }
 0x15c   : > { %v782_v50 = vadd.f32 %v774_v6, %v1624_v40 }
 0x15e   : > { %v760_v12 = vpop.permute.xlu1 %759 }
 0x15f   : > { %v778_v30 = vsel %vm738_vm13, %v760_v12, 0.0 }
 0x160   : > { %v786_v9 = vadd.f32 %v778_v30, %v706_v28 }
 0x163   : > { %v612_v11 = vpop.permute.xlu1 %611 }
 0x164   : > { %v621_v43 = vsel %vm581_vm12, %v612_v11, 0.0 }
 0x165   : > { %v629_v25 = vadd.f32 %v621_v43, %v1585_v37 }
 0x167   : > { %v1656_v21 = vadd.f32 %v701_v46, %v629_v25 }
 0x168   : > { %v638_v36 = vpop.permute.xlu1 %637 }
 0x169   : > { %vm656_vm0 = vcmp.eq.s32.totalorder %v1421_v47, %v638_v36 }
 0x16d   : > { %v748_v59 = vpop.permute.xlu1 %747 }
 0x16e   : > { %v775_v34 = vsel %vm735_vm2, %v748_v59, 0.0  ;;  %vm1000_vm2 = vcmask 261120  }
 0x16f   : > { %v783_v33 = vadd.f32 %v775_v34, %v1628_v42 }
 0x171   : > { %v764_v39 = vpop.permute.xlu1 %763  ;;  %v863_v20 = vadd.f32 %v855_v56, %v783_v33 }
 0x172   : > { %v779_v19 = vsel %vm739_vm7, %v764_v39, 0.0 }
 0x173   : > { %v787_v40 = vadd.f32 %v779_v19, %v1643_v29 }
 0x176   : > { %v804_v26 = vpop.permute.xlu1 %803 }
 0x177   : > { %vm818_vm14 = vcmp.eq.s32.totalorder %v1421_v47, %v804_v26 }
 0x178   : > { %v858_v10 = vsel %vm818_vm14, %v840_v48, 0.0 }
 0x179   : > { %v866_v51 = vadd.f32 %v858_v10, %v786_v9 }
 0x17b   : > { %v641_v22 = vpop.permute.xlu1 %640  ;;  %1136 = vmatprep.mubr.msk.f32.mxu1 %vm870_vm15, %v866_v51 }
 0x17c   : > { %vm657_vm6 = vcmp.eq.s32.totalorder %v1421_v47, %v641_v22 }
 0x17f   : > { %v672_v37 = vpop.permute.xlu1 %671 }
 0x180   : > { %v696_v17 = vsel %vm656_vm0, %v672_v37, 0.0 }
 0x181   : > { %v1662_v52 = vadd.f32 %v696_v17, %v624_v55  ;;  %v798_v55 = vpop.permute.xlu0 %797 }
 0x182   : > { %vm816_vm0 = vcmp.eq.s32.totalorder %v1421_v47, %v798_v55 }
 0x183   : > { %v688_v4 = vpop.permute.xlu1 %687 }
 0x184   : > { %v700_v35 = vsel %vm660_vm1, %v688_v4, 0.0 }
 0x185   : > { %v708_v23 = vadd.f32 %v700_v35, %v628_v57  ;;  %v813_v58 = vpop.permute.xlu0 %812 }
 0x186   : > { %vm821_vm11 = vcmp.eq.s32.totalorder %v1421_v47, %v813_v58 }
 0x188   : > { %v807_v38 = vpop.permute.xlu1 %806 }
 0x189   : > { %vm819_vm8 = vcmp.eq.s32.totalorder %v1421_v47, %v807_v38  ;;  %v848_v45 = vpop.permute.xlu0 %847 }
 0x18c   : > { %v824_v13 = vpop.permute.xlu1 %823 }
 0x18d   : > { %v854_v44 = vsel %vm814_vm5, %v824_v13, 0.0  ;;  %v852_v3 = vpop.permute.xlu0 %851 }
 0x18e   : > { %v862_v31 = vadd.f32 %v854_v44, %v782_v50  ;;  %v861_v18 = vsel %vm821_vm11, %v852_v3, 0.0 }
 0x190   : > { %1130 = vmatprep.mubr.msk.f32.mxu0 %vm870_vm15, %v862_v31 }
 0x191   : > { %v676_v53 = vpop.permute.xlu1 %675  ;;  %1131 = vmatmul.mubr.msk.f32.vlgmr.msra.gmra.mxu0 %vm870_vm15, %v863_v20 }
 0x192   : > { %v697_v49 = vsel %vm657_vm6, %v676_v53, 0.0 }
 0x193   : > { %v705_v28 = vadd.f32 %v697_v49, %v625_v8 }
 0x196   : > { %v718_v32 = vpop.permute.xlu1 %717 }
 0x197   : > { %vm736_vm13 = vcmp.eq.s32.totalorder %v1421_v47, %v718_v32 }
 0x19a   : > { %v730_v42 = vpop.permute.xlu1 %729 }
 0x19b   : > { %vm740_vm10 = vcmp.eq.s32.totalorder %v1421_v47, %v730_v42 }
 0x19f   : > { %v844_v62 = vpop.permute.xlu1 %843 }
 0x1a0   : > { %v859_v54 = vsel %vm819_vm8, %v844_v62, 0.0 }
 0x1a1   : > { %v867_v46 = vadd.f32 %v859_v54, %v787_v40 }
 0x1a3   : > { %1137 = vmatmul.mubr.msk.f32.vlgmr.msra.gmra.mxu1 %vm870_vm15, %v867_v46 }
 0x1a4   : > { %v721_v16 = vpop.permute.xlu1 %720 }
 0x1a5   : > { %vm737_vm14 = vcmp.eq.s32.totalorder %v1421_v47, %v721_v16 }
 0x1a6   : > { %v777_v25 = vsel %vm737_vm14, %v1653_v27, 0.0 }
 0x1a7   : > { %v785_v60 = vadd.f32 %v777_v25, %v705_v28 }
 0x1a8   : > { %v752_v15 = vpop.permute.xlu1 %751 }
 0x1a9   : > { %v776_v24 = vsel %vm736_vm13, %v752_v15, 0.0 }
 0x1aa   : > { %v784_v11 = vadd.f32 %v776_v24, %v1662_v52 }
 0x1ac   : > { %v768_v2 = vpop.permute.xlu1 %767 }
 0x1ad   : > { %v780_v61 = vsel %vm740_vm10, %v768_v2, 0.0 }
 0x1ae   : > { %v788_v57 = vadd.f32 %v780_v61, %v708_v23 }
 0x1b0   : > { %v772_v0 = vpop.permute.xlu1 %771 }
 0x1b1   : > { %v781_v8 = vsel %vm741_vm9, %v772_v0, 0.0 }
 0x1b2   : > { %v789_v29 = vadd.f32 %v781_v8, %v1656_v21 }
 0x1b4   : > { %v869_v41 = vadd.f32 %v861_v18, %v789_v29 }
 0x1b5   : > { %v810_v63 = vpop.permute.xlu1 %809 }
 0x1b6   : > { %vm820_vm12 = vcmp.eq.s32.totalorder %v1421_v47, %v810_v63 }
 0x1b7   : > { %v860_v14 = vsel %vm820_vm12, %v848_v45, 0.0 }
 0x1b8   : > { %v868_v7 = vadd.f32 %v860_v14, %v788_v57 }
 0x1b9   : > { %v801_v12 = vpop.permute.xlu1 %800 }
 0x1ba   : > { %1139 = vmatprep.mubr.msk.f32.mxu1 %vm870_vm15, %v868_v7  ;;  %vm817_vm1 = vcmp.eq.s32.totalorder %v1421_v47, %v801_v12 }
 0x1bb   : > { %1140 = vmatmul.mubr.msk.f32.gmra.mxu1 %vm870_vm15, %v869_v41 }
 0x1bd   : > { %v832_v43 = vpop.permute.xlu1 %831 }
 0x1be   : > { %v856_v21 = vsel %vm816_vm0, %v832_v43, 0.0 }
 0x1bf   : > { %v864_v36 = vadd.f32 %v856_v21, %v784_v11 }
 0x1c1   : > { %v836_v59 = vpop.permute.xlu1 %835  ;;  %1133 = vmatprep.mubr.msk.f32.mxu0 %vm870_vm15, %v864_v36 }
 0x1c2   : > { %v857_v5 = vsel %vm817_vm1, %v836_v59, 0.0 }
 0x1c3   : > { %v865_v39 = vadd.f32 %v857_v5, %v785_v60 }
 0x1c5   : > { %1134 = vmatmul.mubr.msk.f32.gmra.mxu0 %vm870_vm15, %v865_v39 }
 0x251   : > { %v1132_v30 = vpop.f32.mrf.mxu0 }
 0x252   : > { %1002 = vst.msk [vmem:[%s194_s14 + $0x8] sm:$0xff] %vm1000_vm2, %v1132_v30 }
 0x253   : > { %v961_v27 = vpop.f32.mrf.mxu0 }
 0x254   : > { %1001 = vst.msk [vmem:[%s194_s14] sm:$0xff] %vm1000_vm2, %v961_v27 }
 0x263   : > { %v1138_v26 = vpop.f32.mrf.mxu1 }
 0x264   : > { %1006 = vst.msk [vmem:[%s194_s14 + $0x28] sm:$0xff] %vm1000_vm2, %v1138_v26 }
 0x265   : > { %v981_v47 = vpop.f32.mrf.mxu1 }
 0x266   : > { %1005 = vst.msk [vmem:[%s194_s14 + $0x20] sm:$0xff] %vm1000_vm2, %v981_v47 }
 0x27b   : > { %v1141_v9 = vpop.f32.mrf.mxu1 }
 0x27c   : > { %1008 = vst.msk [vmem:[%s194_s14 + $0x38] sm:$0xff] %vm1000_vm2, %v1141_v9 }
 0x27d   : > { %v991_v48 = vpop.f32.mrf.mxu1 }
 0x27e   : > { %1007 = vst.msk [vmem:[%s194_s14 + $0x30] sm:$0xff] %vm1000_vm2, %v991_v48 }
 0x285   : > { %v1135_v10 = vpop.f32.mrf.mxu0 }
 0x286   : > { %1004 = vst.msk [vmem:[%s194_s14 + $0x18] sm:$0xff] %vm1000_vm2, %v1135_v10 }
 0x287   : > { %v971_v51 = vpop.f32.mrf.mxu0 }
 0x288   : > { %1003 = vst.msk [vmem:[%s194_s14 + $0x10] sm:$0xff] %vm1000_vm2, %v971_v51 }
 0x289 PF: > { %s13_s12 = sadd.s32 1, %s1212_s12  }
 0x28a   : > { %p10_p4 = scmp.ge.s32.totalorder %s13_s12, 4  }
 0x28c   :  { %12 = sbr.rel (!%p10_p4) target bundleno = 1 (0x1), region = 65 }

</bundles_post_ra>
